<compile_context>
chip_gen: v5e
topology: v5e:2x2
jax: 0.10.0
libtpu: 0.0.40
codegen_flags: <defaults>
</compile_context>

<pallas_src>
import jax
import jax.numpy as jnp
from jax.experimental import pallas as pl
from jax.experimental.pallas import tpu as pltpu


def _round_up(x, m):
    return (x + m - 1) // m * m


def _pick_tm(m):
    """M tile: ~256-row tiles, and >= 2 tiles whenever possible (v7x megacore),
    while never padding M by more than one tile's worth of rows."""
    if m <= 8:
        return _round_up(max(m, 1), 8)
    n_tiles = max(2, -(-m // 256))
    return _round_up(-(-m // n_tiles), 8)


# ---------------------------------------------------------------------------
# GEMV path (N == 1): VPU multiply + XLU lane reduction, f32 throughout.
# Output block stays resident across the K grid axis -> accumulate in o_ref.
# ---------------------------------------------------------------------------
def _gemv_kernel(x_ref, w_ref, b_ref, o_ref):
    k = pl.program_id(1)

    @pl.when(k == 0)
    def _():
        o_ref[...] = jnp.zeros_like(o_ref)

    # (tm, tk) * (1, tk) -> lane reduce -> (tm, 1); no VMEM scratch needed.
    o_ref[...] += jnp.sum(x_ref[...] * w_ref[...], axis=-1, keepdims=True)

    @pl.when(k == pl.num_programs(1) - 1)
    def _():
        o_ref[...] += b_ref[...]          # bias add once, at finalize


def _gemv(x, w_eff, bias):
    M, K = x.shape
    tm = _pick_tm(M)
    tk = K if K <= 1024 else 1024
    M_pad = _round_up(M, tm)
    K_pad = _round_up(K, tk)

    x_p = x.astype(jnp.float32)
    if (M_pad, K_pad) != (M, K):
        x_p = jnp.pad(x_p, ((0, M_pad - M), (0, K_pad - K)))
    w_row = w_eff.astype(jnp.float32).reshape(1, K)
    if K_pad != K:
        w_row = jnp.pad(w_row, ((0, 0), (0, K_pad - K)))   # exp already applied -> pads are 0
    b = bias.astype(jnp.float32).reshape(1, 1)

    gm, gk = M_pad // tm, K_pad // tk

    cost = pl.CostEstimate(
        flops=2 * M_pad * K_pad,
        transcendentals=0,                                  # exp hoisted to the wrapper
        bytes_accessed=4 * (M_pad * K_pad + gm * K_pad + M_pad + 1),
    )

    out = pl.pallas_call(
        _gemv_kernel,
        out_shape=jax.ShapeDtypeStruct((M_pad, 1), jnp.float32),
        grid_spec=pltpu.PrefetchScalarGridSpec(
            num_scalar_prefetch=0,
            grid=(gm, gk),
            in_specs=[
                pl.BlockSpec((tm, tk), lambda i, k: (i, k)),   # x tile
                pl.BlockSpec((1, tk), lambda i, k: (0, k)),    # weight row slice
                pl.BlockSpec((1, 1), lambda i, k: (0, 0)),     # bias scalar
            ],
            out_specs=pl.BlockSpec((tm, 1), lambda i, k: (i, 0)),
        ),
        compiler_params=pltpu.CompilerParams(
            dimension_semantics=("parallel", "arbitrary"),
            vmem_limit_bytes=48 * 1024 * 1024,
        ),
        cost_estimate=cost,
    )(x_p, w_row, b)

    return out if M_pad == M else out[:M]


# ---------------------------------------------------------------------------
# MXU path (N > 1): bf16 operands (pre-cast in wrapper), f32 accumulation
# directly into the resident output block, bias add at finalize.
# ---------------------------------------------------------------------------
def _mxu_kernel(x_ref, w_ref, b_ref, o_ref):
    k = pl.program_id(2)

    @pl.when(k == 0)
    def _():
        o_ref[...] = jnp.zeros_like(o_ref)

    o_ref[...] += jnp.dot(x_ref[...], w_ref[...], preferred_element_type=jnp.float32)

    @pl.when(k == pl.num_programs(2) - 1)
    def _():
        o_ref[...] += b_ref[...]


def _mxu_matmul(x, w_eff, bias):
    M, K = x.shape
    _, N = w_eff.shape

    tm = _pick_tm(M)
    tn = min(512, _round_up(N, 128))       # lane-dense; 512 is also a 256-multiple (v6e/v7x MXU)
    tk = K if K <= 2048 else 2048          # big K tiles: bf16 weight tile is still <= 2 MiB

    M_pad = _round_up(M, tm)
    N_pad = _round_up(N, tn)
    K_pad = _round_up(K, tk)

    x_bf = x.astype(jnp.bfloat16)          # cast once in the wrapper -> halves x DMA bytes
    if (M_pad, K_pad) != (M, K):
        x_bf = jnp.pad(x_bf, ((0, M_pad - M), (0, K_pad - K)))
    w_bf = w_eff.astype(jnp.bfloat16)      # exp already applied -> padded entries are exact 0
    if (K_pad, N_pad) != (K, N):
        w_bf = jnp.pad(w_bf, ((0, K_pad - K), (0, N_pad - N)))
    b = bias.astype(jnp.float32).reshape(1, N)
    if N_pad != N:
        b = jnp.pad(b, ((0, 0), (0, N_pad - N)))

    gm, gn, gk = M_pad // tm, N_pad // tn, K_pad // tk

    cost = pl.CostEstimate(
        flops=2 * M_pad * N_pad * K_pad,
        transcendentals=0,                 # exp hoisted to the wrapper
        bytes_accessed=(2 * gn * M_pad * K_pad          # x re-read gn times (bf16)
                        + 2 * gm * K_pad * N_pad        # w re-read gm times (bf16)
                        + 4 * M_pad * N_pad + 4 * N_pad),
    )

    out = pl.pallas_call(
        _mxu_kernel,
        out_shape=jax.ShapeDtypeStruct((M_pad, N_pad), jnp.float32),
        grid_spec=pltpu.PrefetchScalarGridSpec(
            num_scalar_prefetch=0,
            grid=(gm, gn, gk),
            in_specs=[
                pl.BlockSpec((tm, tk), lambda i, j, k: (i, k)),   # x tile (bf16)
                pl.BlockSpec((tk, tn), lambda i, j, k: (k, j)),   # weight tile (bf16)
                pl.BlockSpec((1, tn), lambda i, j, k: (0, j)),    # bias row (f32)
            ],
            out_specs=pl.BlockSpec((tm, tn), lambda i, j, k: (i, j)),
        ),
        compiler_params=pltpu.CompilerParams(
            dimension_semantics=("parallel", "parallel", "arbitrary"),
            vmem_limit_bytes=48 * 1024 * 1024,
        ),
        cost_estimate=cost,
    )(x_bf, w_bf, b)

    if (M_pad, N_pad) != (M, N):
        out = out[:M, :N]
    return out


# ---------------------------------------------------------------------------
# Public forward: out = x @ exp(0.01 * weight) + bias   (weight as-is if debug)
# ---------------------------------------------------------------------------
def quad_linear(x, weight, bias=None, *, debug=False):
    M, K = x.shape
    K2, N = weight.shape
    assert K == K2
    if bias is None:
        bias = jnp.zeros((N,), dtype=jnp.float32)

    # exp hoisted out of the kernel: computed exactly once here, not per tile.
    if debug:
        w_eff = weight.astype(jnp.float32)
    else:
        w_eff = jnp.exp(0.01 * weight.astype(jnp.float32))

    if N == 1:                     # the real network (neural_net -> out_features == 1)
        return _gemv(x, w_eff, bias)
    return _mxu_matmul(x, w_eff, bias)


def make_params(in_features, out_features, debug=False):
    # quad_linear_nn.reset_parameters(): weight = -100 everywhere, row 0 = 0;
    # bias = 0.  (debug mode: weight = 0, row 0 = 1.)
    weight = jnp.full((in_features, out_features), -100.0, dtype=jnp.float32)
    weight = weight.at[0, :].set(0.0)
    if debug:
        weight = jnp.zeros((in_features, out_features), dtype=jnp.float32)
        weight = weight.at[0, :].set(1.0)
    bias = jnp.zeros((out_features,), dtype=jnp.float32)
    return weight, bias


if __name__ == "__main__":
    # neural_net(in_d, hidden_layers) wraps quad_linear_nn(in_d, 1):
    # out_features is always 1 -> GEMV path.
    batch, in_d, out_features = 16, 32, 1

    key = jax.random.PRNGKey(0)
    x = jax.random.normal(key, (batch, in_d), dtype=jnp.float32)
    weight, bias = make_params(in_d, out_features, debug=False)

    out = quad_linear(x, weight, bias)
    out = jax.block_until_ready(out)

    # pure-JAX f32 reference of the same forward pass
    ref = x @ jnp.exp(0.01 * weight) + bias
    assert out.shape == (batch, out_features)
    # GEMV path is f32 end-to-end -> tight tolerance.
    assert jnp.allclose(out, ref, atol=1e-4, rtol=1e-4), "GEMV path mismatch vs reference"

    # Sanity-check the padded-MXU path too (used only when out_features > 1);
    # bf16 MXU operands -> loose tolerance here.
    n_wide = 256
    w_wide = jax.random.normal(jax.random.PRNGKey(1), (in_d, n_wide), dtype=jnp.float32)
    b_wide = jax.random.normal(jax.random.PRNGKey(2), (n_wide,), dtype=jnp.float32)
    out_wide = jax.block_until_ready(quad_linear(x, w_wide, b_wide))
    ref_wide = x @ jnp.exp(0.01 * w_wide) + b_wide
    assert out_wide.shape == (batch, n_wide)
    assert jnp.allclose(out_wide, ref_wide, atol=2e-1, rtol=2e-2), "MXU path mismatch vs reference"

    print("KERNEL_OK")
</pallas_src>

<mosaic_0001>
module attributes {stable_mosaic.version = 11 : i64} {
  func.func @_gemv_kernel(%arg0: i32, %arg1: i32, %arg2: memref<8x32xf32, #tpu.memory_space<vmem>>, %arg3: memref<1x32xf32, #tpu.memory_space<vmem>>, %arg4: memref<1x1xf32, #tpu.memory_space<vmem>>, %arg5: memref<8x1xf32, #tpu.memory_space<vmem>>) attributes {dimension_semantics = [#tpu.dimension_semantics<parallel>, #tpu.dimension_semantics<arbitrary>], iteration_bounds = array<i64: 2, 1>, scalar_prefetch = 0 : i64, scratch_operands = 0 : i64, tpu.core_type = #tpu.core_type<tc>, window_params = [{transform_indices = @transform_0, window_bounds = array<i64: 8, 32>}, {transform_indices = @transform_1, window_bounds = array<i64: 1, 32>}, {pipeline_mode = #tpu.pipeline_mode<synchronous>, transform_indices = @transform_2, window_bounds = array<i64: 1, 1>}, {transform_indices = @transform_3, window_bounds = array<i64: 8, 1>}]} {
    %c0_i32 = arith.constant 0 : i32
    %0 = arith.cmpi eq, %arg1, %c0_i32 : i32
    %1 = arith.extui %0 : i1 to i32
    %c0_i32_0 = arith.constant 0 : i32
    %2 = arith.cmpi ne, %1, %c0_i32_0 : i32
    scf.if %2 {
      %cst_10 = arith.constant 0.000000e+00 : f32
      %15 = vector.broadcast %cst_10 : f32 to vector<8x1xf32>
      %c0_11 = arith.constant 0 : index
      %c0_12 = arith.constant 0 : index
      %16 = vector.load %arg5[%c0_11, %c0_12] : memref<8x1xf32, #tpu.memory_space<vmem>>, vector<8x1xf32>
      tpu.vector_store %arg5[%c0_11, %c0_12], %15 {strides = array<i32>} : memref<8x1xf32, #tpu.memory_space<vmem>>, vector<8x1xf32>,
    } else {
    }
    %c0 = arith.constant 0 : index
    %c0_1 = arith.constant 0 : index
    %3 = vector.load %arg5[%c0, %c0_1] : memref<8x1xf32, #tpu.memory_space<vmem>>, vector<8x1xf32>
    %c0_2 = arith.constant 0 : index
    %c0_3 = arith.constant 0 : index
    %4 = vector.load %arg2[%c0_2, %c0_3] : memref<8x32xf32, #tpu.memory_space<vmem>>, vector<8x32xf32>
    %c0_4 = arith.constant 0 : index
    %c0_5 = arith.constant 0 : index
    %5 = vector.load %arg3[%c0_4, %c0_5] : memref<1x32xf32, #tpu.memory_space<vmem>>, vector<1x32xf32>
    %6 = vector.broadcast %5 : vector<1x32xf32> to vector<8x32xf32>
    %7 = arith.mulf %4, %6 : vector<8x32xf32>
    %cst = arith.constant dense<0.000000e+00> : vector<8xf32>
    %8 = vector.multi_reduction <add>, %7, %cst [1] : vector<8x32xf32> to vector<8xf32>
    %9 = vector.shape_cast %8 : vector<8xf32> to vector<8x1xf32>
    %10 = arith.addf %3, %9 : vector<8x1xf32>
    %c0_6 = arith.constant 0 : index
    %c0_7 = arith.constant 0 : index
    %11 = vector.load %arg5[%c0_6, %c0_7] : memref<8x1xf32, #tpu.memory_space<vmem>>, vector<8x1xf32>
    tpu.vector_store %arg5[%c0_6, %c0_7], %10 {strides = array<i32>} : memref<8x1xf32, #tpu.memory_space<vmem>>, vector<8x1xf32>,
    %c0_i32_8 = arith.constant 0 : i32
    %12 = arith.cmpi eq, %arg1, %c0_i32_8 : i32
    %13 = arith.extui %12 : i1 to i32
    %c0_i32_9 = arith.constant 0 : i32
    %14 = arith.cmpi ne, %13, %c0_i32_9 : i32
    scf.if %14 {
      %c0_10 = arith.constant 0 : index
      %c0_11 = arith.constant 0 : index
      %15 = vector.load %arg5[%c0_10, %c0_11] : memref<8x1xf32, #tpu.memory_space<vmem>>, vector<8x1xf32>
      %c0_12 = arith.constant 0 : index
      %c0_13 = arith.constant 0 : index
      %16 = vector.load %arg4[%c0_12, %c0_13] : memref<1x1xf32, #tpu.memory_space<vmem>>, vector<1x1xf32>
      %17 = vector.broadcast %16 : vector<1x1xf32> to vector<8x1xf32>
      %18 = arith.addf %15, %17 : vector<8x1xf32>
      %c0_14 = arith.constant 0 : index
      %c0_15 = arith.constant 0 : index
      %19 = vector.load %arg5[%c0_14, %c0_15] : memref<8x1xf32, #tpu.memory_space<vmem>>, vector<8x1xf32>
      tpu.vector_store %arg5[%c0_14, %c0_15], %18 {strides = array<i32>} : memref<8x1xf32, #tpu.memory_space<vmem>>, vector<8x1xf32>,
    } else {
    }
    return
  }
  func.func @transform_0(%arg0: i32, %arg1: i32) -> (i32, i32) {
    %c0_i32 = arith.constant 0 : i32
    return %arg0, %arg1 : i32, i32
  }
  func.func @transform_1(%arg0: i32, %arg1: i32) -> (i32, i32) {
    %c0_i32 = arith.constant 0 : i32
    %c0_i32_0 = arith.constant 0 : i32
    return %c0_i32, %arg1 : i32, i32
  }
  func.func @transform_2(%arg0: i32, %arg1: i32) -> (i32, i32) {
    %c0_i32 = arith.constant 0 : i32
    %c0_i32_0 = arith.constant 0 : i32
    %c0_i32_1 = arith.constant 0 : i32
    return %c0_i32, %c0_i32_0 : i32, i32
  }
  func.func @transform_3(%arg0: i32, %arg1: i32) -> (i32, i32) {
    %c0_i32 = arith.constant 0 : i32
    %c0_i32_0 = arith.constant 0 : i32
    return %arg0, %c0_i32 : i32, i32
  }
}

</mosaic_0001>

<bundles_post_ra>
// kernel: tpu_custom_call.1
= control target key start
LH: loop header
LB: loop body
LE: loop exit
PB: predicated region body
PF: predicated region fallthrough
CT: control target
= control target key end

     0   :  { %s605_s0 = inlined_call_operand.hbm [shape: f32[16,32], index: 0, kind: input, shape index: {}]   ;;  %s606_s1 = inlined_call_operand.vmem [shape: f32[1,32], index: 1, kind: input, shape index: {}]   ;;  %s607_s2 = inlined_call_operand.<no memory space> [shape: f32[1,1], index: 2, kind: input, shape index: {}]   ;;  %s608_s3 = inlined_call_operand.vmem [shape: f32[16,1], index: 3, kind: output, shape index: {}]  }
   0x1   :  { %v8_v0 = vstv %s607_s2 }
   0x2   :  { %9 = vst [vmem:[#allocation2] sm:$0x1] %v8_v0 }
   0x3   :  { %10 = vsyncpa [#allocation4], 0 }
   0x4   :  { %12 = vsyncpa [#allocation4 + $0x1], 0  ;;  %s511_s14 = smov 0   ;;  %s513_s15 = smov 0  }
   0x5   :  { %s515_s16 = smov 0   ;;  %s517_s17 = smov 0  }
   0x6   :  { %s519_s18 = smov 0   ;;  %s521_s19 = smov 0  }
   0x7 LB: > { %s335_s2 = sadd.s32 4294967295, %s485_s19   ;;  %s30_s20 = sadd.s32 1, %s481_s18  ;;  %s485_s19 = sphi %s521_s19, %s18_s19   ;;  %s481_s18 = sphi %s519_s18, %s615_s18   ;;  %s477_s17 = sphi %s517_s17, %s614_s17   ;;  %s473_s16 = sphi %s515_s16, %s613_s16   ;;  %s469_s15 = sphi %s513_s15, %s612_s15   ;;  %s465_s14 = sphi %s511_s14, %s611_s14  }
   0x8   : > { %p32_p0 = scmp.ge.s32.totalorder %s30_s20, 2  ;;  %s39_s21 = sadd.s32 1, %s473_s16 }
   0x9   : > { %p46_p1 = scmp.ne.s32.totalorder %s473_s16, %s469_s15  ;;  %p47_p2 = scmp.eq.s32.totalorder %s485_s19, 0 }
   0xa   : > { %s617_s20 = smov (%p32_p0, %s30_s20), 0  ;;  %p52_p4 = scmp.ne.s32.totalorder %s469_s15, %s465_s14 }
   0xb   : > { %p547_p3 = por %p47_p2, %p46_p1  ;;  %s34_s23 = ssub.s32 %s481_s18, %s617_s20 }
   0xc   : > { %p53_p5 = scmp.eq.s32.totalorder %s335_s2, 0  ;;  %p37_p6 = scmp.eq.s32.totalorder %s34_s23, 0 }
   0xd   : > { %p353_p8 = scmp.lt.s32.totalorder %s485_s19, 2  ;;  %s158_s26 = sand.u32 1, %s473_s16  }
   0xe   : > { %p554_p7 = por %p53_p5, %p52_p4  ;;  %s341_s27 = sshll.u32 %s481_s18, 3 }
   0xf   : > { %s560_s25 = scalar_select %p37_p6, %s473_s16, %s39_s21  }
  0x10   : > { %s340_s28 = sshll.u32 %s158_s26, 3  ;;  %s167_s4 = scalar_lea.hbm %s605_s0, %s341_s27 }
  0x11   : > { %s169_s5 = sshll.u32 %s167_s4, 4  ;;  %s162_s6 = scalar_lea.vmem [#allocation3], %s340_s28  ;;  %s170_s5 = int_to_ptr.hbm [resolvable:$true] %s169_s5 }
  0x12   : > { %s171_s7 = sshll.u32 %s162_s6, 4  ;;  %p350_p9 = pnand %p353_p8, %p547_p3  ;;  %s172_s7 = int_to_ptr.vmem [resolvable:$true] %s171_s7 }
  0x13   : > { %p342_p10 = scmp.ge.s32.totalorder %s485_s19, 1  ;;  %p176_p11 = scmp.lt.s32.totalorder %s485_s19, 3 }
  0x14   : > { %s159_s8 = scalar_lea.sflag [#allocation4], %s158_s26 }
  0x15   : > { %352 = dma.hbm_to_vmem [thread:$0]  (!%p350_p9), %s170_s5, 128, %s172_s7, %s159_s8  }
  0x16   : > { %p177_p12 = pnand %p342_p10, %p176_p11 }
  0x17   : > { %s182_s9 = sand.u32 (!%p177_p12), 1, %s469_s15  }
  0x18   : > { %180 = sbr.rel (%p177_p12) target bundleno = 164 (0xa4), region = 32  ;;  %s343_s10 = sshll.u32 (!%p177_p12), %s182_s9, 3 }
  0x19   : > { %s183_s11 = scalar_lea.sflag (!%p177_p12), [#allocation4], %s182_s9  ;;  %s186_s12 = scalar_lea.vmem (!%p177_p12), [#allocation3], %s343_s10 }
  0x1d   : > { %460 = dma.done.wait (%p554_p7), %s183_s11, 128  }
  0x1e   : > { %462 = vsyncadd (%p554_p7), %s183_s11, 4294967168  ;;  %p215_p13 = scmp.lt.s32.totalorder %s477_s17, 1  ;;  %vm223_vm0 = vcmask 7168   ;;  %v487_v1 = vmov 0.0   ;;  %v226_v2 = vld [vmem:[%s186_s12] sm:$0xff]  ;;  %vm232_vm1 = vcmask 261120  }
  0x1f   : > { %v403_v3 = vld [vmem:[%s606_s1] ss:$0 sm:$0xff] }
  0x20   : > { %s619_s17 = smov (!%p215_p13, %s477_s17), 1  ;;  %v231_v4 = vmul.f32 %v403_v3, %v226_v2  ;;  %v404_v9 = vld [vmem:[#allocation2] ss:$0 sm:$0xff] }
  0x21   : > { %s344_s13 = sshll.u32 %s619_s17, 3 }
  0x22   : > { %s218_s21 = scalar_lea.vmem %s608_s3, %s344_s13  ;;  %v233_v5 = vsel %vm232_vm1, %v231_v4, 0.0 }
  0x23   : > { %224 = vst.msk [vmem:[%s218_s21] sm:$0xff] %vm223_vm0, %v487_v1  ;;  %234 = vadd.xlane.f32.xlu0 %v233_v5 }
  0x2a   : > { %v225_v6 = vld [vmem:[%s218_s21] sm:$0xff] }
  0x96   : > { %v235_v7 = vpop.xlane.xlu0 %234 }
  0x97   : > { %v236_v8 = vadd.f32 %v235_v7, %v225_v6 }
  0x99   : > { %238 = vst.msk [vmem:[%s218_s21] sm:$0xff] %vm223_vm0, %v236_v8 }
  0xa0   : > { %v242_v10 = vld [vmem:[%s218_s21] sm:$0xff] }
  0xa1   : > { %v247_v11 = vadd.f32 %v404_v9, %v242_v10 }
  0xa3   : > { %248 = vst.msk [vmem:[%s218_s21] sm:$0xff] %vm223_vm0, %v247_v11 }
  0xa4 PF: > { %s18_s19 = sadd.s32 1, %s485_s19   ;;  %s611_s14 = smov %s469_s15 }
  0xa5   : > { %p15_p0 = scmp.ge.s32.totalorder %s18_s19, 4   ;;  %s612_s15 = smov %s473_s16 }
  0xa6   : > { %s613_s16 = smov %s560_s25  ;;  %s614_s17 = smov %s481_s18 }
  0xa7   : > { %s615_s18 = smov %s617_s20  ;;  %17 = sbr.rel (!%p15_p0) target bundleno = 7 (0x7), region = 83 }
  0xac   :  { %268 = vsyncpa [#allocation4], 1 }
  0xad   :  { %270 = vsyncpa [#allocation4 + $0x1], 1 }

</bundles_post_ra>
